<compile_context>
chip_gen: v6e
topology: v6e:2x2x1
jax: 0.10.0
libtpu: 0.0.40
codegen_flags: <defaults>
</compile_context>

<pallas_src>
import jax
import jax.numpy as jnp
from jax.experimental import pallas as pl
from jax.experimental.pallas import tpu as pltpu


def _round_up(x, m):
    return ((x + m - 1) // m) * m


def _maml_kernel(x_ref, w_enc_ref, b_enc_ref, w1_ref, b1_ref, w2_ref, b2_ref,
                 out_ref):
    """One M-tile: fused encoder-Linear + ReLU + Linear + ReLU + Linear."""
    x = x_ref[...]                                                  # bf16 [TM, Din_p]

    # eeg_encoder stand-in: Linear(Din, E) + ReLU  (bf16 MXU, fp32 accumulate)
    h = jnp.dot(x, w_enc_ref[...], preferred_element_type=jnp.float32)
    h = jnp.maximum(h + b_enc_ref[...], 0.0)                        # f32 [TM, E_p]

    # classifier[0]: Linear(E, 64) + ReLU
    h = jnp.dot(h.astype(w1_ref.dtype), w1_ref[...],
                preferred_element_type=jnp.float32)
    h = jnp.maximum(h + b1_ref[...], 0.0)                           # f32 [TM, H_p]

    # classifier[2]: Linear(64, num_classes)
    o = jnp.dot(h.astype(w2_ref.dtype), w2_ref[...],
                preferred_element_type=jnp.float32)
    out_ref[...] = (o + b2_ref[...]).astype(out_ref.dtype)          # f32 [TM, C_p]


def maml_forward(eeg_seq, params, *, tm=128):
    """eeg_seq: [B, C, T] float32. Returns logits [B, num_classes] float32."""
    B = eeg_seq.shape[0]
    x = eeg_seq.reshape(B, -1).astype(jnp.float32)                  # [B, C*T]
    d_in = x.shape[1]

    w_enc, b_enc = params["w_enc"], params["b_enc"]
    w1, b1 = params["w1"], params["b1"]
    w2, b2 = params["w2"], params["b2"]
    E, H, C = w_enc.shape[1], w1.shape[1], w2.shape[1]

    # Pad lane/contraction dims to 128 (lane-dense matmuls + unmasked stores)
    # and the batch to a multiple of the M tile. Zero padding is exact: the
    # padded columns stay zero through ReLU and contribute nothing downstream.
    d_p = _round_up(d_in, 128)
    e_p = _round_up(E, 128)
    h_p = _round_up(H, 128)
    c_p = _round_up(C, 128)
    m_p = _round_up(max(B, tm), tm)

    pad2 = lambda a, r, c: jnp.pad(a, ((0, r - a.shape[0]), (0, c - a.shape[1])))

    x_p = pad2(x, m_p, d_p).astype(jnp.bfloat16)
    w_enc_p = pad2(w_enc, d_p, e_p).astype(jnp.bfloat16)
    w1_p = pad2(w1, e_p, h_p).astype(jnp.bfloat16)
    w2_p = pad2(w2, h_p, c_p).astype(jnp.bfloat16)
    b_enc_p = pad2(b_enc, 1, e_p).astype(jnp.float32)
    b1_p = pad2(b1, 1, h_p).astype(jnp.float32)
    b2_p = pad2(b2, 1, c_p).astype(jnp.float32)

    grid = (m_p // tm,)
    resident = lambda shape: pl.BlockSpec(shape, lambda i: (0, 0))

    flops = 2 * m_p * (d_p * e_p + e_p * h_p + h_p * c_p)
    bytes_accessed = (
        x_p.size * 2
        + (w_enc_p.size + w1_p.size + w2_p.size) * 2
        + (b_enc_p.size + b1_p.size + b2_p.size) * 4
        + m_p * c_p * 4)

    out_p = pl.pallas_call(
        _maml_kernel,
        out_shape=jax.ShapeDtypeStruct((m_p, c_p), jnp.float32),
        grid=grid,
        in_specs=[
            pl.BlockSpec((tm, d_p), lambda i: (i, 0)),              # M-tiled input
            resident(w_enc_p.shape), resident(b_enc_p.shape),       # weights resident
            resident(w1_p.shape), resident(b1_p.shape),
            resident(w2_p.shape), resident(b2_p.shape),
        ],
        out_specs=pl.BlockSpec((tm, c_p), lambda i: (i, 0)),
        compiler_params=pltpu.CompilerParams(
            dimension_semantics=("parallel",)),
        cost_estimate=pl.CostEstimate(
            flops=flops, transcendentals=0, bytes_accessed=bytes_accessed),
    )(x_p, w_enc_p, b_enc_p, w1_p, b1_p, w2_p, b2_p)

    return out_p[:B, :C]


def init_params(key, d_in, embedding_dim, hidden, num_classes):
    """Deterministic synthetic init (PyTorch-Linear-like scaling), fp32 master."""
    ks = jax.random.split(key, 6)

    def lin(kw, kb, fan_in, fan_out):
        bound = 1.0 / jnp.sqrt(fan_in)
        w = jax.random.uniform(kw, (fan_in, fan_out), jnp.float32, -bound, bound)
        b = jax.random.uniform(kb, (1, fan_out), jnp.float32, -bound, bound)
        return w, b

    w_enc, b_enc = lin(ks[0], ks[1], d_in, embedding_dim)
    w1, b1 = lin(ks[2], ks[3], embedding_dim, hidden)
    w2, b2 = lin(ks[4], ks[5], hidden, num_classes)
    return {"w_enc": w_enc, "b_enc": b_enc,
            "w1": w1, "b1": b1, "w2": w2, "b2": b2}


def _reference(eeg_seq, params):
    """Pure-JAX reference with the same bf16-matmul / fp32-accumulate path."""
    x = eeg_seq.reshape(eeg_seq.shape[0], -1).astype(jnp.bfloat16)
    h = jnp.dot(x, params["w_enc"].astype(jnp.bfloat16),
                preferred_element_type=jnp.float32) + params["b_enc"]
    h = jnp.maximum(h, 0.0)
    h = jnp.dot(h.astype(jnp.bfloat16), params["w1"].astype(jnp.bfloat16),
                preferred_element_type=jnp.float32) + params["b1"]
    h = jnp.maximum(h, 0.0)
    return jnp.dot(h.astype(jnp.bfloat16), params["w2"].astype(jnp.bfloat16),
                   preferred_element_type=jnp.float32) + params["b2"]


if __name__ == "__main__":
    # Small, forward-consistent shapes:
    #   batch=2, eeg channels=4, time steps=64 -> Din=256
    #   embedding_dim=32, classifier hidden=64 (fixed by module), num_classes=8
    B, Cch, T = 2, 4, 64
    embedding_dim, hidden, num_classes = 32, 64, 8

    key = jax.random.PRNGKey(0)
    k_x, k_p = jax.random.split(key)

    eeg_seq = jax.random.normal(k_x, (B, Cch, T), dtype=jnp.float32)
    params = init_params(k_p, Cch * T, embedding_dim, hidden, num_classes)

    logits = maml_forward(eeg_seq, params)
    logits = jax.block_until_ready(logits)

    ref = _reference(eeg_seq, params)
    assert logits.shape == (B, num_classes)
    assert jnp.allclose(logits, ref, atol=2e-2, rtol=2e-2), (
        float(jnp.max(jnp.abs(logits - ref))))

    print("KERNEL_OK")
</pallas_src>

<mosaic_0001>
module attributes {stable_mosaic.version = 11 : i64} {
  func.func @_maml_kernel(%arg0: i32, %arg1: memref<128x256xbf16, #tpu.memory_space<vmem>>, %arg2: memref<256x128xbf16, #tpu.memory_space<vmem>>, %arg3: memref<1x128xf32, #tpu.memory_space<vmem>>, %arg4: memref<128x128xbf16, #tpu.memory_space<vmem>>, %arg5: memref<1x128xf32, #tpu.memory_space<vmem>>, %arg6: memref<128x128xbf16, #tpu.memory_space<vmem>>, %arg7: memref<1x128xf32, #tpu.memory_space<vmem>>, %arg8: memref<128x128xf32, #tpu.memory_space<vmem>>) attributes {dimension_semantics = [#tpu.dimension_semantics<parallel>], iteration_bounds = array<i64: 1>, scalar_prefetch = 0 : i64, scratch_operands = 0 : i64, tpu.core_type = #tpu.core_type<tc>, window_params = [{transform_indices = @transform_0, window_bounds = array<i64: 128, 256>}, {pipeline_mode = #tpu.pipeline_mode<synchronous>, transform_indices = @transform_1, window_bounds = array<i64: 256, 128>}, {pipeline_mode = #tpu.pipeline_mode<synchronous>, transform_indices = @transform_2, window_bounds = array<i64: 1, 128>}, {pipeline_mode = #tpu.pipeline_mode<synchronous>, transform_indices = @transform_3, window_bounds = array<i64: 128, 128>}, {pipeline_mode = #tpu.pipeline_mode<synchronous>, transform_indices = @transform_4, window_bounds = array<i64: 1, 128>}, {pipeline_mode = #tpu.pipeline_mode<synchronous>, transform_indices = @transform_5, window_bounds = array<i64: 128, 128>}, {pipeline_mode = #tpu.pipeline_mode<synchronous>, transform_indices = @transform_6, window_bounds = array<i64: 1, 128>}, {transform_indices = @transform_7, window_bounds = array<i64: 128, 128>}]} {
    %c0 = arith.constant 0 : index
    %c0_0 = arith.constant 0 : index
    %0 = vector.load %arg1[%c0, %c0_0] : memref<128x256xbf16, #tpu.memory_space<vmem>>, vector<128x256xbf16>
    %c0_1 = arith.constant 0 : index
    %c0_2 = arith.constant 0 : index
    %1 = vector.load %arg2[%c0_1, %c0_2] : memref<256x128xbf16, #tpu.memory_space<vmem>>, vector<256x128xbf16>
    %cst = arith.constant dense<0.000000e+00> : vector<128x128xf32>
    %2 = tpu.matmul %0, %1, %cst {dimension_numbers = #tpu.dot_dimension_numbers<[1], [0], [0], [1], [0, 0, 1, 1], [], []>} : vector<128x256xbf16>, vector<256x128xbf16>, vector<128x128xf32> -> vector<128x128xf32>
    %c0_3 = arith.constant 0 : index
    %c0_4 = arith.constant 0 : index
    %3 = vector.load %arg3[%c0_3, %c0_4] : memref<1x128xf32, #tpu.memory_space<vmem>>, vector<1x128xf32>
    %4 = vector.broadcast %3 : vector<1x128xf32> to vector<128x128xf32>
    %5 = arith.addf %2, %4 : vector<128x128xf32>
    %cst_5 = arith.constant 0.000000e+00 : f32
    %6 = vector.broadcast %cst_5 : f32 to vector<128x128xf32>
    %7 = arith.maximumf %5, %6 : vector<128x128xf32>
    %8 = arith.truncf %7 : vector<128x128xf32> to vector<128x128xbf16>
    %c0_6 = arith.constant 0 : index
    %c0_7 = arith.constant 0 : index
    %9 = vector.load %arg4[%c0_6, %c0_7] : memref<128x128xbf16, #tpu.memory_space<vmem>>, vector<128x128xbf16>
    %cst_8 = arith.constant dense<0.000000e+00> : vector<128x128xf32>
    %10 = tpu.matmul %8, %9, %cst_8 {dimension_numbers = #tpu.dot_dimension_numbers<[1], [0], [0], [1], [0, 0, 1, 1], [], []>} : vector<128x128xbf16>, vector<128x128xbf16>, vector<128x128xf32> -> vector<128x128xf32>
    %c0_9 = arith.constant 0 : index
    %c0_10 = arith.constant 0 : index
    %11 = vector.load %arg5[%c0_9, %c0_10] : memref<1x128xf32, #tpu.memory_space<vmem>>, vector<1x128xf32>
    %12 = vector.broadcast %11 : vector<1x128xf32> to vector<128x128xf32>
    %13 = arith.addf %10, %12 : vector<128x128xf32>
    %cst_11 = arith.constant 0.000000e+00 : f32
    %14 = vector.broadcast %cst_11 : f32 to vector<128x128xf32>
    %15 = arith.maximumf %13, %14 : vector<128x128xf32>
    %16 = arith.truncf %15 : vector<128x128xf32> to vector<128x128xbf16>
    %c0_12 = arith.constant 0 : index
    %c0_13 = arith.constant 0 : index
    %17 = vector.load %arg6[%c0_12, %c0_13] : memref<128x128xbf16, #tpu.memory_space<vmem>>, vector<128x128xbf16>
    %cst_14 = arith.constant dense<0.000000e+00> : vector<128x128xf32>
    %18 = tpu.matmul %16, %17, %cst_14 {dimension_numbers = #tpu.dot_dimension_numbers<[1], [0], [0], [1], [0, 0, 1, 1], [], []>} : vector<128x128xbf16>, vector<128x128xbf16>, vector<128x128xf32> -> vector<128x128xf32>
    %c0_15 = arith.constant 0 : index
    %c0_16 = arith.constant 0 : index
    %19 = vector.load %arg7[%c0_15, %c0_16] : memref<1x128xf32, #tpu.memory_space<vmem>>, vector<1x128xf32>
    %20 = vector.broadcast %19 : vector<1x128xf32> to vector<128x128xf32>
    %21 = arith.addf %18, %20 : vector<128x128xf32>
    %c0_17 = arith.constant 0 : index
    %c0_18 = arith.constant 0 : index
    %22 = vector.load %arg8[%c0_17, %c0_18] : memref<128x128xf32, #tpu.memory_space<vmem>>, vector<128x128xf32>
    tpu.vector_store %arg8[%c0_17, %c0_18], %21 {strides = array<i32>} : memref<128x128xf32, #tpu.memory_space<vmem>>, vector<128x128xf32>,
    return
  }
  func.func @transform_0(%arg0: i32) -> (i32, i32) {
    %c0_i32 = arith.constant 0 : i32
    %c0_i32_0 = arith.constant 0 : i32
    return %arg0, %c0_i32 : i32, i32
  }
  func.func @transform_1(%arg0: i32) -> (i32, i32) {
    %c0_i32 = arith.constant 0 : i32
    %c0_i32_0 = arith.constant 0 : i32
    %c0_i32_1 = arith.constant 0 : i32
    return %c0_i32, %c0_i32_0 : i32, i32
  }
  func.func @transform_2(%arg0: i32) -> (i32, i32) {
    %c0_i32 = arith.constant 0 : i32
    %c0_i32_0 = arith.constant 0 : i32
    %c0_i32_1 = arith.constant 0 : i32
    return %c0_i32, %c0_i32_0 : i32, i32
  }
  func.func @transform_3(%arg0: i32) -> (i32, i32) {
    %c0_i32 = arith.constant 0 : i32
    %c0_i32_0 = arith.constant 0 : i32
    %c0_i32_1 = arith.constant 0 : i32
    return %c0_i32, %c0_i32_0 : i32, i32
  }
  func.func @transform_4(%arg0: i32) -> (i32, i32) {
    %c0_i32 = arith.constant 0 : i32
    %c0_i32_0 = arith.constant 0 : i32
    %c0_i32_1 = arith.constant 0 : i32
    return %c0_i32, %c0_i32_0 : i32, i32
  }
  func.func @transform_5(%arg0: i32) -> (i32, i32) {
    %c0_i32 = arith.constant 0 : i32
    %c0_i32_0 = arith.constant 0 : i32
    %c0_i32_1 = arith.constant 0 : i32
    return %c0_i32, %c0_i32_0 : i32, i32
  }
  func.func @transform_6(%arg0: i32) -> (i32, i32) {
    %c0_i32 = arith.constant 0 : i32
    %c0_i32_0 = arith.constant 0 : i32
    %c0_i32_1 = arith.constant 0 : i32
    return %c0_i32, %c0_i32_0 : i32, i32
  }
  func.func @transform_7(%arg0: i32) -> (i32, i32) {
    %c0_i32 = arith.constant 0 : i32
    %c0_i32_0 = arith.constant 0 : i32
    return %arg0, %c0_i32 : i32, i32
  }
}

</mosaic_0001>

<bundles_post_ra>
// kernel: tpu_custom_call.1
= control target key start
LH: loop header
LB: loop body
LE: loop exit
PB: predicated region body
PF: predicated region fallthrough
CT: control target
= control target key end

     0   :  { %12 = vsyncpa [#allocation3], 0  ;;  %s1320_s0 = inlined_call_operand.hbm [shape: bf16[128,256], index: 0, kind: input, shape index: {}]   ;;  %s1321_s1 = inlined_call_operand.hbm [shape: bf16[256,128], index: 1, kind: input, shape index: {}]   ;;  %s1322_s2 = inlined_call_operand.vmem [shape: f32[1,128], index: 2, kind: input, shape index: {}]   ;;  %s1323_s3 = inlined_call_operand.hbm [shape: bf16[128,128], index: 3, kind: input, shape index: {}]   ;;  %s1324_s4 = inlined_call_operand.vmem [shape: f32[1,128], index: 4, kind: input, shape index: {}]   ;;  %s1325_s5 = inlined_call_operand.hbm [shape: bf16[128,128], index: 5, kind: input, shape index: {}]   ;;  %s1326_s6 = inlined_call_operand.vmem [shape: f32[1,128], index: 6, kind: input, shape index: {}]   ;;  %s1327_s7 = inlined_call_operand.hbm [shape: f32[128,128], index: 7, kind: output, shape index: {}]  }
   0x1   :  { %13 = vsyncpa [#allocation6], 0 }
   0x2   :  { %14 = vsyncpa [#allocation9], 0 }
   0x3   :  { %15 = vsyncpa [#allocation4], 0  ;;  %s1214_s24 = smov [#allocation5]  }
   0x4   :  { %s33_s25 = sshll.u32 %s1214_s24, 4  ;;  %s34_s25 = int_to_ptr.vmem [resolvable:$true] %s33_s25 }
   0x5   :  { %s1114_s26 = scalar_lea.vmem %s34_s25, 2048  ;;  %p1119_p1 = scmp.lt.s32.totalorder %s34_s25, %s34_s25 }
   0x6   :  { %p1115_p0 = scmp.ne.s32.totalorder %s34_s25, %s1114_s26  ;;  %p1120_p2 = scmp.lt.s32.totalorder %s1114_s26, %s1114_s26 }
   0x8   :  { %p1121_p3 = por %p1120_p2, %p1119_p1 }
   0xa   :  { %p1122_p4 = pnand %p1121_p3, %p1115_p0 }
   0xc   :  { %1125 = shalt.err (!%p1122_p4)
}
   0xd   :  { %s1215_s27 = smov 64   ;;  %s1216_s28 = smov 4  }
   0xe   :  { %39 = dma.hbm_to_vmem [thread:$0]  %s1321_s1, 2048, %s34_s25, [#allocation6], %s1215_s27, %s1215_s27, %s1216_s28  }
   0xf   :  { %s1217_s8 = smov [#allocation2]  }
  0x10   :  { %s21_s9 = sshll.u32 %s1217_s8, 4  ;;  %s22_s9 = int_to_ptr.vmem [resolvable:$true] %s21_s9 }
  0x11   :  { %s1134_s10 = scalar_lea.vmem %s22_s9, 2048  ;;  %p1139_p6 = scmp.lt.s32.totalorder %s22_s9, %s22_s9 }
  0x12   :  { %p1135_p5 = scmp.ne.s32.totalorder %s22_s9, %s1134_s10  ;;  %p1140_p7 = scmp.lt.s32.totalorder %s1134_s10, %s1134_s10 }
  0x14   :  { %p1141_p8 = por %p1140_p7, %p1139_p6 }
  0x16   :  { %p1142_p9 = pnand %p1141_p8, %p1135_p5 }
  0x18   :  { %1145 = shalt.err (!%p1142_p9)
}
  0x19   :  { %s1218_s11 = smov 128   ;;  %s1219_s12 = smov 8  }
  0x1a   :  { %27 = dma.hbm_to_vmem [thread:$0]  %s1320_s0, 2048, %s22_s9, [#allocation3], %s1218_s11, %s1218_s11, %s1219_s12  }
  0x1b   :  { %s1220_s1 = smov [#allocation7]   ;;  %s1221_s16 = smov [#allocation8]  }
  0x1c   :  { %s47_s15 = sshll.u32 %s1220_s1, 4  ;;  %s61_s17 = sshll.u32 %s1221_s16, 4  ;;  %s48_s15 = int_to_ptr.vmem [resolvable:$true] %s47_s15  ;;  %s62_s17 = int_to_ptr.vmem [resolvable:$true] %s61_s17 }
  0x1d   :  { %s1154_s18 = scalar_lea.vmem %s48_s15, 1024  ;;  %p1159_p11 = scmp.lt.s32.totalorder %s48_s15, %s48_s15 }
  0x1e   :  { %p1155_p10 = scmp.ne.s32.totalorder %s48_s15, %s1154_s18  ;;  %p1160_p12 = scmp.lt.s32.totalorder %s1154_s18, %s1154_s18 }
  0x20   :  { %p1161_p13 = por %p1160_p12, %p1159_p11 }
  0x22   :  { %p1162_p0 = pnand %p1161_p13, %p1155_p10 }
  0x24   :  { %1165 = shalt.err (!%p1162_p0)
}
  0x25   :  { %53 = dma.hbm_to_vmem [thread:$0]  %s1323_s3, 1024, %s48_s15, [#allocation6], %s1215_s27, %s1215_s27, %s1216_s28  }
  0x26   :  { %s1174_s0 = scalar_lea.vmem %s62_s17, 1024  ;;  %p1179_p2 = scmp.lt.s32.totalorder %s62_s17, %s62_s17 }
  0x27   :  { %p1175_p1 = scmp.ne.s32.totalorder %s62_s17, %s1174_s0  ;;  %p1180_p3 = scmp.lt.s32.totalorder %s1174_s0, %s1174_s0 }
  0x29   :  { %p1181_p4 = por %p1180_p3, %p1179_p2 }
  0x2b   :  { %p1182_p5 = pnand %p1181_p4, %p1175_p1 }
  0x2d   :  { %1185 = shalt.err (!%p1182_p5)
}
  0x2e   :  { %67 = dma.hbm_to_vmem [thread:$0]  %s1325_s5, 1024, %s62_s17, [#allocation9], %s1215_s27, %s1215_s27, %s1216_s28  }
  0x2f   :  { %1206 = dma.done.wait [#allocation3], 2048  }
  0x30   :  { %1207 = vsyncadd [#allocation3], 4294965248 }
  0x31   :  { %1208 = dma.done.wait [#allocation6], 3072  }
  0x32   :  { %1209 = vsyncadd [#allocation6], 4294964224 }
  0x33   :  { %1210 = dma.done.wait [#allocation9], 1024  }
  0x34   :  { %1211 = vsyncadd [#allocation9], 4294966272  ;;  %v1050_v0 = vld [vmem:[#allocation5 + $0x78] sm:$0xff]   ;;  %v1052_v2 = vld [vmem:[#allocation5 + $0x70] sm:$0xff]  }
  0x35   :  { %v1051_v1 = vld [vmem:[#allocation5 + $0x38] sm:$0xff]   ;;  %881 = vmatprep.subr.bf16.mxu0 %v1050_v0  ;;  %v1053_v3 = vld [vmem:[#allocation5 + $0x30] sm:$0xff]   ;;  %v1054_v4 = vld [vmem:[#allocation5 + $0x68] sm:$0xff]  }
  0x36   :  { %882 = vmatpush3.bf16.msra.mxu0 %v1051_v1  ;;  %v1055_v5 = vld [vmem:[#allocation5 + $0x28] sm:$0xff]   ;;  %v1056_v6 = vld [vmem:[#allocation5 + $0x60] sm:$0xff]   ;;  %v1058_v8 = vld [vmem:[#allocation5 + $0x58] sm:$0xff]  }
  0x37   :  { %883 = vmatprep.subr.bf16.mxu0 %v1052_v2  ;;  %v1057_v7 = vld [vmem:[#allocation5 + $0x20] sm:$0xff]   ;;  %v1059_v9 = vld [vmem:[#allocation5 + $0x18] sm:$0xff]   ;;  %v1060_v10 = vld [vmem:[#allocation5 + $0x50] sm:$0xff]  }
  0x38   :  { %v1068_v11 = vld [vmem:[#allocation2 + $0x4] ss:$8 sps:$4 sm:$0xff]   ;;  %v1061_v12 = vld [vmem:[#allocation5 + $0x10] sm:$0xff]   ;;  %v1090_v17 = vld [vmem:[#allocation7 + $0x38] sm:$0xff]  }
  0x39   :  { %346 = vmatprep.mubr.bf16.mxu0 %v1068_v11  ;;  %v1062_v13 = vld [vmem:[#allocation5 + $0x48] sm:$0xff]   ;;  %v1064_v15 = vld [vmem:[#allocation5 + $0x40] sm:$0xff]   ;;  %v1091_v19 = vld [vmem:[#allocation7 + $0x30] sm:$0xff]   ;;  %977 = vmatprep.subr.bf16.mxu1 %v1090_v17 }
  0x3a   :  { %884 = vmatpush3.bf16.msra.mxu0 %v1053_v3  ;;  %v1063_v14 = vld [vmem:[#allocation5 + $0x8] sm:$0xff]   ;;  %v1065_v16 = vld [vmem:[#allocation5] sm:$0xff]   ;;  %v1069_v20 = vld [vmem:[#allocation2 + $0x14] ss:$8 sps:$4 sm:$0xff]   ;;  %978 = vmatpush3.bf16.msra.mxu1 %v1090_v17 }
  0x3b   :  { %885 = vmatprep.subr.bf16.mxu0 %v1054_v4  ;;  %v1066_v18 = vld [vmem:[#allocation2] ss:$8 sps:$4 sm:$0xff]   ;;  %979 = vmatprep.subr.bf16.mxu1 %v1091_v19  ;;  %v1071_v22 = vld [vmem:[#allocation2 + $0x10] ss:$8 sps:$4 sm:$0xff]   ;;  %v1072_v23 = vld [vmem:[#allocation2 + $0x24] ss:$8 sps:$4 sm:$0xff]  }
  0x3c   :  { %v1092_v21 = vld [vmem:[#allocation7 + $0x28] sm:$0xff]   ;;  %v1075_v25 = vld [vmem:[#allocation2 + $0x34] ss:$8 sps:$4 sm:$0xff]   ;;  %v1077_v26 = vld [vmem:[#allocation2 + $0x30] ss:$8 sps:$4 sm:$0xff]  }
  0x3d   :  { %v1074_v24 = vld [vmem:[#allocation2 + $0x20] ss:$8 sps:$4 sm:$0xff]   ;;  %v1078_v27 = vld [vmem:[#allocation2 + $0x44] ss:$8 sps:$4 sm:$0xff]   ;;  %v1081_v29 = vld [vmem:[#allocation2 + $0x54] ss:$8 sps:$4 sm:$0xff]  }
  0x3e   :  { %886 = vmatpush3.bf16.msra.mxu0 %v1055_v5  ;;  %980 = vmatpush3.bf16.msra.mxu1 %v1091_v19  ;;  %v1080_v28 = vld [vmem:[#allocation2 + $0x40] ss:$8 sps:$4 sm:$0xff]   ;;  %v1083_v30 = vld [vmem:[#allocation2 + $0x50] ss:$8 sps:$4 sm:$0xff]   ;;  %v1084_v31 = vld [vmem:[#allocation2 + $0x64] ss:$8 sps:$4 sm:$0xff]  }
  0x3f   :  { %887 = vmatprep.subr.bf16.mxu0 %v1056_v6  ;;  %981 = vmatprep.subr.bf16.mxu1 %v1092_v21  ;;  %v1086_v32 = vld [vmem:[#allocation2 + $0x60] ss:$8 sps:$4 sm:$0xff]   ;;  %v1087_v33 = vld [vmem:[#allocation2 + $0x74] ss:$8 sps:$4 sm:$0xff]   ;;  %v1089_v34 = vld [vmem:[#allocation2 + $0x70] ss:$8 sps:$4 sm:$0xff]  }
  0x40   :  { %v1093_v35 = vld [vmem:[#allocation7 + $0x20] sm:$0xff]   ;;  %v1094_v36 = vld [vmem:[#allocation7 + $0x18] sm:$0xff]   ;;  %v1095_v37 = vld [vmem:[#allocation7 + $0x10] sm:$0xff]  }
  0x41   :  { %v1096_v38 = vld [vmem:[#allocation7 + $0x8] sm:$0xff]   ;;  %v1097_v39 = vld [vmem:[#allocation7] sm:$0xff]   ;;  %v1098_v40 = vld [vmem:[#allocation8 + $0x38] sm:$0xff]  }
  0x42   :  { %888 = vmatpush3.bf16.msra.mxu0 %v1057_v7  ;;  %982 = vmatpush3.bf16.msra.mxu1 %v1092_v21  ;;  %v1290_v45 = vld [vmem:[%s1322_s2] ss:$0 sm:$0xff]  ;;  %v1099_v4 = vld [vmem:[#allocation8 + $0x30] sm:$0xff]  }
  0x43   :  { %889 = vmatprep.subr.bf16.mxu0 %v1058_v8  ;;  %983 = vmatprep.subr.bf16.mxu1 %v1093_v35  ;;  %v1101_v17 = vld [vmem:[#allocation8 + $0x20] sm:$0xff]  }
  0x46   :  { %890 = vmatpush3.bf16.msra.mxu0 %v1059_v9  ;;  %984 = vmatpush3.bf16.msra.mxu1 %v1093_v35 }
  0x47   :  { %891 = vmatprep.subr.bf16.mxu0 %v1060_v10  ;;  %985 = vmatprep.subr.bf16.mxu1 %v1094_v36  ;;  %v1100_v10 = vld [vmem:[#allocation8 + $0x28] sm:$0xff]  }
  0x4a   :  { %892 = vmatpush3.bf16.msra.mxu0 %v1061_v12  ;;  %986 = vmatpush3.bf16.msra.mxu1 %v1094_v36 }
  0x4b   :  { %893 = vmatprep.subr.bf16.mxu0 %v1062_v13  ;;  %987 = vmatprep.subr.bf16.mxu1 %v1095_v37 }
  0x4e   :  { %894 = vmatpush3.bf16.msra.mxu0 %v1063_v14  ;;  %988 = vmatpush3.bf16.msra.mxu1 %v1095_v37 }
  0x4f   :  { %895 = vmatprep.subr.bf16.mxu0 %v1064_v15  ;;  %989 = vmatprep.subr.bf16.mxu1 %v1096_v38 }
  0x52   :  { %896 = vmatpush3.bf16.msra.mxu0 %v1065_v16  ;;  %990 = vmatpush3.bf16.msra.mxu1 %v1096_v38 }
  0x53   :  { %991 = vmatprep.subr.bf16.mxu1 %v1097_v39 }
  0x55   :  { %347 = vmatmul.mubr.bf16.vlgmr.msra.gmra.mxu0 %v1066_v18 }
  0x56   :  { %354 = vmatprep.mubr.bf16.mxu0 %v1069_v20  ;;  %992 = vmatpush3.bf16.msra.mxu1 %v1097_v39 }
  0x57   :  { %1009 = vmatprep.subr.bf16.mxu1 %v1098_v40 }
  0x5d   :  { %355 = vmatmul.mubr.bf16.gmra.mxu0 %v1071_v22 }
  0x5e   :  { %362 = vmatprep.mubr.bf16.mxu0 %v1072_v23  ;;  %v1102_v23 = vld [vmem:[#allocation8 + $0x18] sm:$0xff]  }
  0x65   :  { %363 = vmatmul.mubr.bf16.gmra.mxu0 %v1074_v24 }
  0x66   :  { %370 = vmatprep.mubr.bf16.mxu0 %v1075_v25 }
  0x6d   :  { %371 = vmatmul.mubr.bf16.gmra.mxu0 %v1077_v26 }
  0x6e   :  { %378 = vmatprep.mubr.bf16.mxu0 %v1078_v27 }
  0x75   :  { %379 = vmatmul.mubr.bf16.gmra.mxu0 %v1080_v28 }
  0x76   :  { %386 = vmatprep.mubr.bf16.mxu0 %v1081_v29 }
  0x7d   :  { %387 = vmatmul.mubr.bf16.gmra.mxu0 %v1083_v30 }
  0x7e   :  { %394 = vmatprep.mubr.bf16.mxu0 %v1084_v31 }
  0x85   :  { %395 = vmatmul.mubr.bf16.gmra.mxu0 %v1086_v32 }
  0x86   :  { %402 = vmatprep.mubr.bf16.mxu0 %v1087_v33 }
  0x8d   :  { %403 = vmatmul.mubr.bf16.gmra.mxu0 %v1089_v34 }
 0x115   :  { %v897_v41 = vpop.f32.mrf.mxu0 }
 0x117   :  { %v898_v42 = vpop.f32.mrf.mxu0 }
 0x118   :  { %v899_v43 = vadd.f32 %v898_v42, %v897_v41 }
 0x119   :  { %v900_v44 = vpop.f32.mrf.mxu0 }
 0x11a   :  { %v349_v48 = vadd.f32 %v899_v43, %v1290_v45 }
 0x11b   :  { %v901_v46 = vpop.f32.mrf.mxu0 }
 0x11c   :  { %v902_v47 = vadd.f32 %v901_v46, %v900_v44  ;;  %v411_v53 = vmax.f32 %v349_v48, 0.0 }
 0x11d   :  { %v903_v49 = vpop.f32.mrf.mxu0 }
 0x11e   :  { %v352_v50 = vadd.f32 %v902_v47, %v1290_v45 }
 0x11f   :  { %v904_v51 = vpop.f32.mrf.mxu0 }
 0x120   :  { %v905_v52 = vadd.f32 %v904_v51, %v903_v49  ;;  %v412_v54 = vmax.f32 %v352_v50, 0.0 }
 0x121   :  { %v906_v55 = vpop.f32.mrf.mxu0 }
 0x122   :  { %v427_v56 = vpack.c.bf16 %v412_v54, %v411_v53  ;;  %v357_v58 = vadd.f32 %v905_v52, %v1290_v45 }
 0x123   :  { %v907_v57 = vpop.f32.mrf.mxu0 }
 0x124   :  { %v908_v59 = vadd.f32 %v907_v57, %v906_v55  ;;  %993 = vmatprep.mubr.bf16.mxu1 %v427_v56  ;;  %v413_v63 = vmax.f32 %v357_v58, 0.0 }
 0x125   :  { %v909_v60 = vpop.f32.mrf.mxu0 }
 0x126   :  { %v360_v61 = vadd.f32 %v908_v59, %v1290_v45 }
 0x127   :  { %v910_v62 = vpop.f32.mrf.mxu0 }
 0x128   :  { %v414_v0 = vmax.f32 %v360_v61, 0.0  ;;  %v911_v1 = vadd.f32 %v910_v62, %v909_v60 }
 0x129   :  { %v912_v2 = vpop.f32.mrf.mxu0 }
 0x12a   :  { %v428_v3 = vpack.c.bf16 %v414_v0, %v413_v63  ;;  %v365_v6 = vadd.f32 %v911_v1, %v1290_v45 }
 0x12b   :  { %v913_v5 = vpop.f32.mrf.mxu0 }
 0x12c   :  { %v914_v7 = vadd.f32 %v913_v5, %v912_v2  ;;  %994 = vmatmul.mubr.bf16.vlgmr.msra.gmra.mxu1 %v428_v3  ;;  %v415_v12 = vmax.f32 %v365_v6, 0.0 }
 0x12d   :  { %v915_v8 = vpop.f32.mrf.mxu0  ;;  %1010 = vmatpush3.bf16.msra.mxu1 %v1098_v40 }
 0x12e   :  { %v368_v9 = vadd.f32 %v914_v7, %v1290_v45  ;;  %1011 = vmatprep.subr.bf16.mxu1 %v1099_v4  ;;  %v1103_v7 = vld [vmem:[#allocation8 + $0x10] sm:$0xff]  }
 0x12f   :  { %v916_v11 = vpop.f32.mrf.mxu0 }
 0x130   :  { %v416_v13 = vmax.f32 %v368_v9, 0.0  ;;  %v917_v14 = vadd.f32 %v916_v11, %v915_v8  ;;  %v1104_v8 = vld [vmem:[#allocation8 + $0x8] sm:$0xff]   ;;  %v1105_v9 = vld [vmem:[#allocation8] sm:$0xff]  }
 0x131   :  { %v918_v15 = vpop.f32.mrf.mxu0  ;;  %1012 = vmatpush3.bf16.msra.mxu1 %v1099_v4 }
 0x132   :  { %v429_v16 = vpack.c.bf16 %v416_v13, %v415_v12  ;;  %1013 = vmatprep.subr.bf16.mxu1 %v1100_v10  ;;  %v373_v19 = vadd.f32 %v917_v14, %v1290_v45  ;;  %v863_v12 = vld [vmem:[%s1324_s4] ss:$0 sm:$0xff] }
 0x133   :  { %v919_v18 = vpop.f32.mrf.mxu0 }
 0x134   :  { %v920_v20 = vadd.f32 %v919_v18, %v918_v15  ;;  %997 = vmatprep.mubr.bf16.mxu1 %v429_v16  ;;  %v417_v25 = vmax.f32 %v373_v19, 0.0 }
 0x135   :  { %v921_v21 = vpop.f32.mrf.mxu0  ;;  %1014 = vmatpush3.bf16.msra.mxu1 %v1100_v10 }
 0x136   :  { %v376_v22 = vadd.f32 %v920_v20, %v1290_v45  ;;  %1015 = vmatprep.subr.bf16.mxu1 %v1101_v17 }
 0x137   :  { %v922_v24 = vpop.f32.mrf.mxu0 }
 0x138   :  { %v418_v26 = vmax.f32 %v376_v22, 0.0  ;;  %v923_v27 = vadd.f32 %v922_v24, %v921_v21 }
 0x139   :  { %v924_v28 = vpop.f32.mrf.mxu0  ;;  %1016 = vmatpush3.bf16.msra.mxu1 %v1101_v17 }
 0x13a   :  { %v430_v29 = vpack.c.bf16 %v418_v26, %v417_v25  ;;  %1017 = vmatprep.subr.bf16.mxu1 %v1102_v23  ;;  %v381_v31 = vadd.f32 %v923_v27, %v1290_v45 }
 0x13b   :  { %v925_v30 = vpop.f32.mrf.mxu0 }
 0x13c   :  { %v926_v32 = vadd.f32 %v925_v30, %v924_v28  ;;  %998 = vmatmul.mubr.bf16.gmra.mxu1 %v430_v29  ;;  %v419_v36 = vmax.f32 %v381_v31, 0.0 }
 0x13d   :  { %v927_v33 = vpop.f32.mrf.mxu0  ;;  %1018 = vmatpush3.bf16.msra.mxu1 %v1102_v23 }
 0x13e   :  { %v384_v34 = vadd.f32 %v926_v32, %v1290_v45  ;;  %1019 = vmatprep.subr.bf16.mxu1 %v1103_v7 }
 0x13f   :  { %v928_v35 = vpop.f32.mrf.mxu0 }
 0x140   :  { %v420_v37 = vmax.f32 %v384_v34, 0.0  ;;  %v929_v38 = vadd.f32 %v928_v35, %v927_v33 }
 0x141   :  { %v930_v39 = vpop.f32.mrf.mxu0  ;;  %1020 = vmatpush3.bf16.msra.mxu1 %v1103_v7 }
 0x142   :  { %v431_v40 = vpack.c.bf16 %v420_v37, %v419_v36  ;;  %v389_v42 = vadd.f32 %v929_v38, %v1290_v45  ;;  %1021 = vmatprep.subr.bf16.mxu1 %v1104_v8 }
 0x143   :  { %v931_v41 = vpop.f32.mrf.mxu0 }
 0x144   :  { %v932_v43 = vadd.f32 %v931_v41, %v930_v39  ;;  %1001 = vmatprep.mubr.bf16.mxu1 %v431_v40  ;;  %v421_v48 = vmax.f32 %v389_v42, 0.0 }
 0x145   :  { %v933_v44 = vpop.f32.mrf.mxu0  ;;  %1022 = vmatpush3.bf16.msra.mxu1 %v1104_v8 }
 0x146   :  { %v392_v46 = vadd.f32 %v932_v43, %v1290_v45  ;;  %1023 = vmatprep.subr.bf16.mxu1 %v1105_v9 }
 0x147   :  { %v934_v47 = vpop.f32.mrf.mxu0 }
 0x148   :  { %v422_v49 = vmax.f32 %v392_v46, 0.0  ;;  %v935_v50 = vadd.f32 %v934_v47, %v933_v44 }
 0x149   :  { %v936_v51 = vpop.f32.mrf.mxu0  ;;  %1024 = vmatpush3.bf16.msra.mxu1 %v1105_v9 }
 0x14a   :  { %v432_v52 = vpack.c.bf16 %v422_v49, %v421_v48  ;;  %v397_v54 = vadd.f32 %v935_v50, %v1290_v45 }
 0x14b   :  { %v937_v53 = vpop.f32.mrf.mxu0 }
 0x14c   :  { %v938_v55 = vadd.f32 %v937_v53, %v936_v51  ;;  %1002 = vmatmul.mubr.bf16.gmra.mxu1 %v432_v52  ;;  %v423_v59 = vmax.f32 %v397_v54, 0.0 }
 0x14d   :  { %v939_v56 = vpop.f32.mrf.mxu0 }
 0x14e   :  { %v400_v57 = vadd.f32 %v938_v55, %v1290_v45 }
 0x14f   :  { %v940_v58 = vpop.f32.mrf.mxu0 }
 0x150   :  { %v424_v60 = vmax.f32 %v400_v57, 0.0  ;;  %v941_v61 = vadd.f32 %v940_v58, %v939_v56 }
 0x151   :  { %v942_v62 = vpop.f32.mrf.mxu0 }
 0x152   :  { %v433_v63 = vpack.c.bf16 %v424_v60, %v423_v59  ;;  %v405_v1 = vadd.f32 %v941_v61, %v1290_v45 }
 0x153   :  { %v943_v0 = vpop.f32.mrf.mxu0 }
 0x154   :  { %v944_v2 = vadd.f32 %v943_v0, %v942_v62  ;;  %1005 = vmatprep.mubr.bf16.mxu1 %v433_v63  ;;  %v425_v4 = vmax.f32 %v405_v1, 0.0 }
 0x156   :  { %v408_v3 = vadd.f32 %v944_v2, %v1290_v45 }
 0x158   :  { %v426_v5 = vmax.f32 %v408_v3, 0.0  ;;  %v872_v3 = vld [vmem:[%s1326_s6] ss:$0 sm:$0xff]  ;;  %s1222_s6 = smov [#allocation10]  }
 0x159   :  { %s816_s25 = sshll.u32 %s1222_s6, 4  ;;  %s817_s25 = int_to_ptr.vmem [resolvable:$true] %s816_s25 }
 0x15a   :  { %v434_v6 = vpack.c.bf16 %v426_v5, %v425_v4  ;;  %s1186_s26 = scalar_lea.vmem %s817_s25, 2048  ;;  %p1191_p7 = scmp.lt.s32.totalorder %s817_s25, %s817_s25 }
 0x15b   :  { %p1187_p6 = scmp.ne.s32.totalorder %s817_s25, %s1186_s26  ;;  %p1192_p8 = scmp.lt.s32.totalorder %s1186_s26, %s1186_s26 }
 0x15c   :  { %1006 = vmatmul.mubr.bf16.gmra.mxu1 %v434_v6 }
 0x15d   :  { %p1193_p9 = por %p1192_p8, %p1191_p7 }
 0x15f   :  { %p1194_p10 = pnand %p1193_p9, %p1187_p6 }
 0x1ec   :  { %v995_v10 = vpop.f32.mrf.mxu1 }
 0x1ed   :  { %v549_v15 = vadd.f32 %v995_v10, %v863_v12 }
 0x1ee   :  { %v540_v11 = vpop.f32.mrf.mxu1 }
 0x1ef   :  { %v541_v13 = vadd.f32 %v863_v12, %v540_v11  ;;  %v605_v21 = vmax.f32 %v549_v15, 0.0 }
 0x1f0   :  { %v996_v45 = vpop.f32.mrf.mxu1 }
 0x1f1   :  { %v552_v14 = vadd.f32 %v996_v45, %v863_v12  ;;  %v603_v19 = vmax.f32 %v541_v13, 0.0 }
 0x1f2   :  { %v543_v16 = vpop.f32.mrf.mxu1 }
 0x1f3   :  { %v544_v17 = vadd.f32 %v863_v12, %v543_v16  ;;  %v606_v18 = vmax.f32 %v552_v14, 0.0 }
 0x1f5   :  { %v604_v20 = vmax.f32 %v544_v17, 0.0  ;;  %v620_v23 = vpack.c.bf16 %v606_v18, %v605_v21 }
 0x1f7   :  { %v619_v22 = vpack.c.bf16 %v604_v20, %v603_v19 }
 0x1f9   :  { %1025 = vmatprep.mubr.bf16.mxu1 %v619_v22 }
 0x1fa   :  { %1026 = vmatmul.mubr.bf16.vlgmr.msra.gmra.mxu1 %v620_v23 }
 0x1fc   :  { %v999_v24 = vpop.f32.mrf.mxu1 }
 0x1fd   :  { %v565_v29 = vadd.f32 %v999_v24, %v863_v12 }
 0x1fe   :  { %v556_v25 = vpop.f32.mrf.mxu1 }
 0x1ff   :  { %v557_v27 = vadd.f32 %v863_v12, %v556_v25  ;;  %v609_v35 = vmax.f32 %v565_v29, 0.0 }
 0x200   :  { %v1000_v26 = vpop.f32.mrf.mxu1 }
 0x201   :  { %v568_v28 = vadd.f32 %v1000_v26, %v863_v12  ;;  %v607_v33 = vmax.f32 %v557_v27, 0.0 }
 0x202   :  { %v559_v30 = vpop.f32.mrf.mxu1 }
 0x203   :  { %v560_v31 = vadd.f32 %v863_v12, %v559_v30  ;;  %v610_v32 = vmax.f32 %v568_v28, 0.0 }
 0x205   :  { %v608_v34 = vmax.f32 %v560_v31, 0.0  ;;  %v622_v37 = vpack.c.bf16 %v610_v32, %v609_v35 }
 0x207   :  { %v621_v36 = vpack.c.bf16 %v608_v34, %v607_v33 }
 0x209   :  { %1029 = vmatprep.mubr.bf16.mxu1 %v621_v36 }
 0x20a   :  { %1030 = vmatmul.mubr.bf16.gmra.mxu1 %v622_v37 }
 0x20c   :  { %v1003_v38 = vpop.f32.mrf.mxu1 }
 0x20d   :  { %v581_v43 = vadd.f32 %v1003_v38, %v863_v12 }
 0x20e   :  { %v572_v39 = vpop.f32.mrf.mxu1 }
 0x20f   :  { %v573_v41 = vadd.f32 %v863_v12, %v572_v39  ;;  %v613_v50 = vmax.f32 %v581_v43, 0.0 }
 0x210   :  { %v1004_v40 = vpop.f32.mrf.mxu1 }
 0x211   :  { %v584_v42 = vadd.f32 %v1004_v40, %v863_v12  ;;  %v611_v48 = vmax.f32 %v573_v41, 0.0 }
 0x212   :  { %v575_v44 = vpop.f32.mrf.mxu1 }
 0x213   :  { %v576_v46 = vadd.f32 %v863_v12, %v575_v44  ;;  %v614_v47 = vmax.f32 %v584_v42, 0.0 }
 0x215   :  { %v612_v49 = vmax.f32 %v576_v46, 0.0  ;;  %v624_v52 = vpack.c.bf16 %v614_v47, %v613_v50 }
 0x217   :  { %v623_v51 = vpack.c.bf16 %v612_v49, %v611_v48 }
 0x219   :  { %1033 = vmatprep.mubr.bf16.mxu1 %v623_v51 }
 0x21a   :  { %1034 = vmatmul.mubr.bf16.gmra.mxu1 %v624_v52 }
 0x21c   :  { %v1007_v53 = vpop.f32.mrf.mxu1 }
 0x21d   :  { %v597_v58 = vadd.f32 %v1007_v53, %v863_v12 }
 0x21e   :  { %v588_v54 = vpop.f32.mrf.mxu1 }
 0x21f   :  { %v589_v56 = vadd.f32 %v863_v12, %v588_v54  ;;  %v617_v0 = vmax.f32 %v597_v58, 0.0 }
 0x220   :  { %v1008_v55 = vpop.f32.mrf.mxu1 }
 0x221   :  { %v600_v57 = vadd.f32 %v1008_v55, %v863_v12  ;;  %v615_v62 = vmax.f32 %v589_v56, 0.0 }
 0x222   :  { %v591_v59 = vpop.f32.mrf.mxu1 }
 0x223   :  { %v592_v60 = vadd.f32 %v863_v12, %v591_v59  ;;  %v618_v61 = vmax.f32 %v600_v57, 0.0 }
 0x225   :  { %v616_v63 = vmax.f32 %v592_v60, 0.0  ;;  %v626_v2 = vpack.c.bf16 %v618_v61, %v617_v0 }
 0x227   :  { %v625_v1 = vpack.c.bf16 %v616_v63, %v615_v62 }
 0x229   :  { %1037 = vmatprep.mubr.bf16.mxu1 %v625_v1 }
 0x22a   :  { %1038 = vmatmul.mubr.bf16.gmra.mxu1 %v626_v2 }
 0x2ba   :  { %v1027_v4 = vpop.f32.mrf.mxu1 }
 0x2bb   :  { %v741_v5 = vadd.f32 %v1027_v4, %v872_v3 }
 0x2bc   :  { %v732_v6 = vpop.f32.mrf.mxu1 }
 0x2bd   :  { %797 = vst [vmem:[#allocation10 + $0x10] sm:$0xff] %v741_v5  ;;  %v733_v7 = vadd.f32 %v872_v3, %v732_v6 }
 0x2be   :  { %v1028_v8 = vpop.f32.mrf.mxu1 }
 0x2bf   :  { %795 = vst [vmem:[#allocation10] sm:$0xff] %v733_v7  ;;  %v744_v9 = vadd.f32 %v1028_v8, %v872_v3 }
 0x2c0   :  { %v735_v10 = vpop.f32.mrf.mxu1 }
 0x2c1   :  { %798 = vst [vmem:[#allocation10 + $0x18] sm:$0xff] %v744_v9  ;;  %v736_v11 = vadd.f32 %v872_v3, %v735_v10 }
 0x2c3   :  { %796 = vst [vmem:[#allocation10 + $0x8] sm:$0xff] %v736_v11 }
 0x2ca   :  { %v1031_v12 = vpop.f32.mrf.mxu1 }
 0x2cb   :  { %v757_v45 = vadd.f32 %v1031_v12, %v872_v3 }
 0x2cc   :  { %v748_v13 = vpop.f32.mrf.mxu1 }
 0x2cd   :  { %801 = vst [vmem:[#allocation10 + $0x30] sm:$0xff] %v757_v45  ;;  %v749_v14 = vadd.f32 %v872_v3, %v748_v13 }
 0x2ce   :  { %v1032_v15 = vpop.f32.mrf.mxu1 }
 0x2cf   :  { %799 = vst [vmem:[#allocation10 + $0x20] sm:$0xff] %v749_v14  ;;  %v760_v16 = vadd.f32 %v1032_v15, %v872_v3 }
 0x2d0   :  { %v751_v17 = vpop.f32.mrf.mxu1 }
 0x2d1   :  { %802 = vst [vmem:[#allocation10 + $0x38] sm:$0xff] %v760_v16  ;;  %v752_v18 = vadd.f32 %v872_v3, %v751_v17 }
 0x2d3   :  { %800 = vst [vmem:[#allocation10 + $0x28] sm:$0xff] %v752_v18 }
 0x2da   :  { %v1035_v19 = vpop.f32.mrf.mxu1 }
 0x2db   :  { %v773_v20 = vadd.f32 %v1035_v19, %v872_v3 }
 0x2dc   :  { %v764_v21 = vpop.f32.mrf.mxu1 }
 0x2dd   :  { %805 = vst [vmem:[#allocation10 + $0x50] sm:$0xff] %v773_v20  ;;  %v765_v22 = vadd.f32 %v872_v3, %v764_v21 }
 0x2de   :  { %v1036_v23 = vpop.f32.mrf.mxu1 }
 0x2df   :  { %803 = vst [vmem:[#allocation10 + $0x40] sm:$0xff] %v765_v22  ;;  %v776_v24 = vadd.f32 %v1036_v23, %v872_v3 }
 0x2e0   :  { %v767_v25 = vpop.f32.mrf.mxu1 }
 0x2e1   :  { %806 = vst [vmem:[#allocation10 + $0x58] sm:$0xff] %v776_v24  ;;  %v768_v26 = vadd.f32 %v872_v3, %v767_v25 }
 0x2e3   :  { %804 = vst [vmem:[#allocation10 + $0x48] sm:$0xff] %v768_v26 }
 0x2ea   :  { %v1039_v27 = vpop.f32.mrf.mxu1 }
 0x2eb   :  { %v789_v28 = vadd.f32 %v1039_v27, %v872_v3 }
 0x2ec   :  { %v780_v29 = vpop.f32.mrf.mxu1 }
 0x2ed   :  { %809 = vst [vmem:[#allocation10 + $0x70] sm:$0xff] %v789_v28  ;;  %v781_v30 = vadd.f32 %v872_v3, %v780_v29 }
 0x2ee   :  { %v1040_v31 = vpop.f32.mrf.mxu1 }
 0x2ef   :  { %807 = vst [vmem:[#allocation10 + $0x60] sm:$0xff] %v781_v30  ;;  %v792_v32 = vadd.f32 %v1040_v31, %v872_v3 }
 0x2f0   :  { %v783_v33 = vpop.f32.mrf.mxu1 }
 0x2f1   :  { %810 = vst [vmem:[#allocation10 + $0x78] sm:$0xff] %v792_v32  ;;  %v784_v34 = vadd.f32 %v872_v3, %v783_v33 }
 0x2f3   :  { %808 = vst [vmem:[#allocation10 + $0x68] sm:$0xff] %v784_v34 }
 0x2f4   :  { %1197 = shalt.err (!%p1194_p10)
}
 0x2f5   :  { %822 = dma.vmem_to_hbm [thread:$0]  %s817_s25, 2048, %s1327_s7, [#allocation4], %s1218_s11, %s1218_s11, %s1219_s12  }
 0x2f6   :  { %1212 = dma.done.wait [#allocation4], 2048  }
 0x2f7   :  { %1213 = vsyncadd [#allocation4], 4294965248 }
 0x2f8   :  { %826 = vsyncpa [#allocation3], 1 }
 0x2f9   :  { %827 = vsyncpa [#allocation6], 1 }
 0x2fa   :  { %828 = vsyncpa [#allocation9], 1 }
 0x2fb   :  { %829 = vsyncpa [#allocation4], 1 }

</bundles_post_ra>
